<compile_context>
chip_gen: v7x
topology: tpu7x:2x2x1
jax: 0.10.0
libtpu: 0.0.40
codegen_flags: <defaults>
</compile_context>

<pallas_src>
import functools

import jax
import jax.numpy as jnp
from jax.experimental import pallas as pl
from jax.experimental.pallas import tpu as pltpu


def _label_smooth_loss_kernel(x_ref, t_ref, o_ref, *, smoothing, num_classes):
    # x_ref: (TM, C) logits tile; t_ref: (TM, 1) int32 targets; o_ref: (TM, 1) f32
    x = x_ref[...].astype(jnp.float32)          # (TM, C), classes on the lane axis
    t = t_ref[...]                              # (TM, 1) int32
    tm, c = x.shape

    # Row-wise log-softmax pieces (shifted by the row max for stability).
    m = jnp.max(x, axis=-1, keepdims=True)                       # (TM, 1)
    z = x - m                                                    # (TM, C)
    lse = jnp.log(jnp.sum(jnp.exp(z), axis=-1, keepdims=True))   # (TM, 1)

    # z[target] via one masked reduction (no (TM, C) weight tensor, no gather).
    cls_idx = jax.lax.broadcasted_iota(jnp.int32, (tm, c), 1)
    z_at_t = jnp.sum(jnp.where(cls_idx == t, z, 0.0), axis=-1, keepdims=True)

    sum_z = jnp.sum(z, axis=-1, keepdims=True)                   # (TM, 1)

    off_val = jnp.float32(smoothing / (num_classes - 1.0))
    on_val = jnp.float32(1.0 - smoothing)

    # Weights sum to 1 per row => loss_row = lse - off*sum(z) - (on-off)*z_t.
    o_ref[...] = lse - off_val * sum_z - (on_val - off_val) * z_at_t


def _choose_tm(n, c, itemsize, max_rows=1024, budget_bytes=4 << 20):
    """Pick a row tile: multiple of 8, <= max_rows, ~<=4 MiB per buffer."""
    if n <= 8:
        return n                                   # full-dim block is always legal
    rows_fit = max(budget_bytes // max(c * itemsize, 1), 8)
    tm = min(max_rows, rows_fit, n)
    tm = max((tm // 8) * 8, 8)
    if tm >= n:
        return n                                   # single full block
    return tm


def label_smooth_loss(x, target, smoothing=0.0, *, block_rows=1024):
    """x: (N, C) float array (f32 or bf16), target: (N,) int array -> scalar f32."""
    n, c = x.shape
    t2d = target.astype(jnp.int32).reshape(n, 1)

    tm = _choose_tm(n, c, x.dtype.itemsize, max_rows=block_rows)
    grid = pl.cdiv(n, tm)

    kernel = functools.partial(
        _label_smooth_loss_kernel,
        smoothing=float(smoothing),
        num_classes=c,           # total class count (not per-tile), per spec
    )

    cost = pl.CostEstimate(
        flops=6 * n * c,
        transcendentals=n * c + n,
        bytes_accessed=n * c * x.dtype.itemsize + n * 4 + n * 4,
    )

    per_row = pl.pallas_call(
        kernel,
        out_shape=jax.ShapeDtypeStruct((n, 1), jnp.float32),
        grid=(grid,),
        in_specs=[
            pl.BlockSpec((tm, c), lambda i: (i, 0)),   # logits tile
            pl.BlockSpec((tm, 1), lambda i: (i, 0)),   # targets tile
        ],
        out_specs=pl.BlockSpec((tm, 1), lambda i: (i, 0)),
        compiler_params=pltpu.CompilerParams(
            dimension_semantics=("parallel",)),
        cost_estimate=cost,
    )(x, t2d)

    # Mean over the true batch size (partial last tiles are clipped on writeback).
    return jnp.sum(per_row) / jnp.float32(n)


def _reference(x, target, smoothing):
    log_prob = jax.nn.log_softmax(x.astype(jnp.float32), axis=-1)
    n, c = x.shape
    weight = jnp.full((n, c), smoothing / (c - 1.0), jnp.float32)
    onehot = jax.nn.one_hot(target, c, dtype=jnp.float32)
    weight = weight * (1.0 - onehot) + onehot * (1.0 - smoothing)
    return jnp.mean(jnp.sum(-weight * log_prob, axis=-1))


if __name__ == "__main__":
    key = jax.random.PRNGKey(0)
    k_x, k_t = jax.random.split(key)

    N, C = 20, 32          # N not a multiple of the 8-row tile -> partial-block path
    smoothing = 0.1

    x = jax.random.normal(k_x, (N, C), dtype=jnp.float32)
    target = jax.random.randint(k_t, (N,), 0, C, dtype=jnp.int32)

    # f32 logits, small row tile to exercise the multi-tile grid (3 tiles).
    loss = label_smooth_loss(x, target, smoothing=smoothing, block_rows=8)
    loss = jax.block_until_ready(loss)
    ref = _reference(x, target, smoothing)
    assert jnp.allclose(loss, ref, atol=1e-5, rtol=1e-5), (loss, ref)

    # bf16 logits streamed as bf16, upcast inside the kernel (default tiling).
    xb = x.astype(jnp.bfloat16)
    loss_b = jax.block_until_ready(
        label_smooth_loss(xb, target, smoothing=smoothing))
    ref_b = _reference(xb, target, smoothing)
    assert jnp.allclose(loss_b, ref_b, atol=1e-4, rtol=1e-4), (loss_b, ref_b)

    # Zero smoothing (pure NLL of log-softmax) path.
    loss_0 = jax.block_until_ready(label_smooth_loss(x, target, smoothing=0.0))
    ref_0 = _reference(x, target, 0.0)
    assert jnp.allclose(loss_0, ref_0, atol=1e-5, rtol=1e-5), (loss_0, ref_0)

    print("KERNEL_OK")
</pallas_src>

<mosaic_0001>
module attributes {stable_mosaic.version = 11 : i64} {
  func.func @_label_smooth_loss_kernel(%arg0: i32, %arg1: memref<8x32xf32, #tpu.memory_space<vmem>>, %arg2: memref<8x1xi32, #tpu.memory_space<vmem>>, %arg3: memref<8x1xf32, #tpu.memory_space<vmem>>) attributes {dimension_semantics = [#tpu.dimension_semantics<parallel>], iteration_bounds = array<i64: 3>, scalar_prefetch = 0 : i64, scratch_operands = 0 : i64, tpu.core_type = #tpu.core_type<tc>, window_params = [{transform_indices = @transform_0, window_bounds = array<i64: 8, 32>}, {transform_indices = @transform_1, window_bounds = array<i64: 8, 1>}, {transform_indices = @transform_2, window_bounds = array<i64: 8, 1>}]} {
    %c0 = arith.constant 0 : index
    %c0_0 = arith.constant 0 : index
    %0 = vector.load %arg1[%c0, %c0_0] : memref<8x32xf32, #tpu.memory_space<vmem>>, vector<8x32xf32>
    %c0_1 = arith.constant 0 : index
    %c0_2 = arith.constant 0 : index
    %1 = vector.load %arg2[%c0_1, %c0_2] : memref<8x1xi32, #tpu.memory_space<vmem>>, vector<8x1xi32>
    %cst = arith.constant dense<0xFF800000> : vector<8xf32>
    %2 = vector.multi_reduction <maximumf>, %0, %cst [1] : vector<8x32xf32> to vector<8xf32>
    %3 = vector.shape_cast %2 : vector<8xf32> to vector<8x1xf32>
    %4 = vector.broadcast %3 : vector<8x1xf32> to vector<8x32xf32>
    %5 = arith.subf %0, %4 : vector<8x32xf32>
    %6 = math.exp %5 : vector<8x32xf32>
    %cst_3 = arith.constant dense<0.000000e+00> : vector<8xf32>
    %7 = vector.multi_reduction <add>, %6, %cst_3 [1] : vector<8x32xf32> to vector<8xf32>
    %8 = vector.shape_cast %7 : vector<8xf32> to vector<8x1xf32>
    %9 = math.log %8 : vector<8x1xf32>
    %10 = tpu.iota {dimensions = array<i32: 1>} : vector<8x32xi32>
    %11 = vector.broadcast %1 : vector<8x1xi32> to vector<8x32xi32>
    %12 = arith.cmpi eq, %10, %11 : vector<8x32xi32>
    %cst_4 = arith.constant 0.000000e+00 : f32
    %13 = vector.broadcast %cst_4 : f32 to vector<8x32xf32>
    %14 = arith.select %12, %5, %13 : vector<8x32xi1>, vector<8x32xf32>
    %cst_5 = arith.constant dense<0.000000e+00> : vector<8xf32>
    %15 = vector.multi_reduction <add>, %14, %cst_5 [1] : vector<8x32xf32> to vector<8xf32>
    %16 = vector.shape_cast %15 : vector<8xf32> to vector<8x1xf32>
    %cst_6 = arith.constant dense<0.000000e+00> : vector<8xf32>
    %17 = vector.multi_reduction <add>, %5, %cst_6 [1] : vector<8x32xf32> to vector<8xf32>
    %18 = vector.shape_cast %17 : vector<8xf32> to vector<8x1xf32>
    %cst_7 = arith.constant 0.0032258064 : f32
    %19 = vector.broadcast %cst_7 : f32 to vector<8x1xf32>
    %20 = arith.mulf %19, %18 : vector<8x1xf32>
    %21 = arith.subf %9, %20 : vector<8x1xf32>
    %cst_8 = arith.constant 0.899999976 : f32
    %cst_9 = arith.constant 0.0032258064 : f32
    %22 = arith.subf %cst_8, %cst_9 : f32
    %23 = vector.broadcast %22 : f32 to vector<8x1xf32>
    %24 = arith.mulf %23, %16 : vector<8x1xf32>
    %25 = arith.subf %21, %24 : vector<8x1xf32>
    %c0_10 = arith.constant 0 : index
    %c0_11 = arith.constant 0 : index
    %26 = vector.load %arg3[%c0_10, %c0_11] : memref<8x1xf32, #tpu.memory_space<vmem>>, vector<8x1xf32>
    tpu.vector_store %arg3[%c0_10, %c0_11], %25 {strides = array<i32>} : memref<8x1xf32, #tpu.memory_space<vmem>>, vector<8x1xf32>,
    return
  }
  func.func @transform_0(%arg0: i32) -> (i32, i32) {
    %c0_i32 = arith.constant 0 : i32
    %c0_i32_0 = arith.constant 0 : i32
    return %arg0, %c0_i32 : i32, i32
  }
  func.func @transform_1(%arg0: i32) -> (i32, i32) {
    %c0_i32 = arith.constant 0 : i32
    %c0_i32_0 = arith.constant 0 : i32
    return %arg0, %c0_i32 : i32, i32
  }
  func.func @transform_2(%arg0: i32) -> (i32, i32) {
    %c0_i32 = arith.constant 0 : i32
    %c0_i32_0 = arith.constant 0 : i32
    return %arg0, %c0_i32 : i32, i32
  }
}

</mosaic_0001>

<bundles_post_ra>
// kernel: tpu_custom_call.1
= control target key start
LH: loop header
LB: loop body
LE: loop exit
PB: predicated region body
PF: predicated region fallthrough
CT: control target
= control target key end

     0   :  { %s302_s9 = smov 0   ;;  %s331_s0 = inlined_call_operand.vmem [shape: f32[20,32], index: 0, kind: input, shape index: {}]   ;;  %s332_s1 = inlined_call_operand.vmem [shape: s32[20,1], index: 1, kind: input, shape index: {}]   ;;  %s333_s2 = inlined_call_operand.vmem [shape: f32[20,1], index: 2, kind: output, shape index: {}]  }
   0x1 LB: > { %s254_s10 = sadd.s32 4294967295, %s284_s9   ;;  %p258_p0 = scmp.ge.s32.totalorder %s284_s9, 1  ;;  %s284_s9 = sphi %s302_s9, %s12_s9  }
   0x2   : > { %p120_p1 = scmp.lt.s32.totalorder %s284_s9, 4 }
   0x4   : > { %p121_p2 = pnand %p258_p0, %p120_p1 }
   0x5   : > { %p144_p3 = scmp.lt.s32.totalorder (!%p121_p2), %s254_s10, 2  ;;  %v286_v0 = vmov (!%p121_p2), 0   ;;  %vm158_vm0 = vcmask (!%p121_p2), 261120   ;;  %v170_v7 = vlaneseq (!%p121_p2)  ;;  %vm187_vm2 = vcmask (!%p121_p2), 7168  }
   0x6   : > { %124 = sbr.rel (%p121_p2) target bundleno = 336 (0x150), region = 28  ;;  %273 = vset.pattern.permute.xlu0 (!%p121_p2), %v286_v0 }
   0x7   : > { %v171_v8 = vand.u32 (!%p121_p2), 127, %v170_v7 }
   0xd   : > { %s335_s10 = smov (!%p144_p3, %s254_s10), 2 }
   0xe   : > { %s310_s11 = sshll.u32 %s335_s10, 3 }
   0xf   : > { %s147_s14 = scalar_lea.vmem %s331_s0, %s310_s11  ;;  %s151_s17 = scalar_lea.vmem %s332_s1, %s310_s11 }
  0x10   : > { %v156_v1 = vld [vmem:[%s147_s14] sm:$0xff]  ;;  %s155_s20 = scalar_lea.vmem %s333_s2, %s310_s11 }
  0x11   : > { %v159_v2 = vsel %vm158_vm0, %v156_v1, -inf  ;;  %v157_v3 = vld [vmem:[%s151_s17] sm:$0xff] }
  0x12   : > { %160 = vmax.xlane.f32.xlu0 %v159_v2 }
  0x28   : > { %173 = vperm.xlu0 %273, %v157_v3  }
  0x9f   : > { %v161_v4 = vpop.xlane.xlu0 %160 }
  0xa0   : > { %v162_v5 = vsub.f32 %v156_v1, %v161_v4 }
  0xa2   : > { %v163_v6 = vmul.f32 1.442695, %v162_v5  ;;  %v180_v12 = vsel %vm158_vm0, %v162_v5, 0.0 }
  0xa4   : > { %274 = vpow2.f32 %v163_v6 }
  0xa7   : > { %v174_v10 = vpop.permute.xlu0 %173 }
  0xa8   : > { %vm175_vm1 = vcmp.eq.s32.totalorder %v171_v8, %v174_v10 }
  0xa9   : > { %v176_v13 = vsel %vm175_vm1, %v162_v5, 0.0 }
  0xaa   : > { %v177_v14 = vsel %vm158_vm0, %v176_v13, 0.0 }
  0xae   : > { %v275_v9 = vpop.eup %274 }
  0xaf   : > { %v165_v11 = vsel %vm158_vm0, %v275_v9, 0.0 }
  0xb0   : > { %166 = vadd.xlane.f32.xlu1 %v165_v11 }
  0xb4   : > { %181 = vadd.xlane.f32.xlu1 %v180_v12 }
  0xb8   : > { %178 = vadd.xlane.f32.xlu1 %v177_v14 }
 0x13d   : > { %v167_v15 = vpop.xlane.xlu1 %166 }
 0x13e   : > { %276 = vlog2.f32 %v167_v15 }
 0x141   : > { %v182_v16 = vpop.xlane.xlu1 %181 }
 0x142   : > { %v183_v20 = vmul.f32 0.0032258064, %v182_v16 }
 0x145   : > { %v179_v18 = vpop.xlane.xlu1 %178 }
 0x146   : > { %v185_v22 = vmul.f32 0.8967742, %v179_v18 }
 0x148   : > { %v277_v17 = vpop.eup %276 }
 0x149   : > { %v169_v19 = vmul.f32 0.6931472, %v277_v17 }
 0x14b   : > { %v184_v21 = vsub.f32 %v169_v19, %v183_v20 }
 0x14d   : > { %v186_v23 = vsub.f32 %v184_v21, %v185_v22 }
 0x14f   : > { %188 = vst.msk [vmem:[%s155_s20] sm:$0xff] %vm187_vm2, %v186_v23 }
 0x150 PF: > { %s12_s9 = sadd.s32 1, %s284_s9  }
 0x151   : > { %p9_p4 = scmp.ge.s32.totalorder %s12_s9, 5  }
 0x153   :  { %11 = sbr.rel (!%p9_p4) target bundleno = 1 (0x1), region = 61 }

</bundles_post_ra>
